<compile_context>
chip_gen: v7x
topology: tpu7x:2x2x1
jax: 0.10.0
libtpu: 0.0.40
codegen_flags: <defaults>
</compile_context>

<pallas_src>
import functools

import jax
import jax.numpy as jnp
from jax import lax
from jax.experimental import pallas as pl
from jax.experimental.pallas import tpu as pltpu


# --------------------------------------------------------------------------
# helpers
# --------------------------------------------------------------------------
_COUT = 12      # 3 * 4 wavelet RGB channels
_NP = 128       # lane-padded Cout (12 -> 128) for lane-dense adds / stores


def _round_up(n, m):
    return ((n + m - 1) // m) * m


def _pick_tm(m):
    """Largest row tile <= 512 that still gives >= 2 grid steps when possible."""
    for tm in (512, 256, 128, 64, 32, 16, 8):
        if m >= 2 * tm:
            return tm
    return 8


# --------------------------------------------------------------------------
# Pallas kernel: fused 1x1 conv  ==  (M, Cin) @ (Cin, 128) + bias (+ skip add)
#   bf16 A/B operands on the MXU, float32 accumulation / epilogue.
# --------------------------------------------------------------------------
def _conv1x1_kernel(has_skip, x_ref, w_ref, b_ref, *rest):
    if has_skip:
        skip_ref, o_ref = rest
    else:
        (o_ref,) = rest
    acc = jnp.dot(x_ref[...], w_ref[...], preferred_element_type=jnp.float32)
    out = acc + b_ref[...]
    if has_skip:
        out = out + skip_ref[...]
    o_ref[...] = out


def _conv1x1_fused(params, x_nhwc, skip_pre=None):
    """x_nhwc (N,H,W,Cin), skip_pre (N,H,W,12) or None -> (N,H,W,12) float32."""
    N, H, W, Cin = x_nhwc.shape
    M = N * H * W
    w_pad = params['w_pad']                      # (Kp, 128) bf16, padded at init
    b_pad = params['b_pad']                      # (1, 128)  f32, padded at init
    Kp = w_pad.shape[0]

    tm = _pick_tm(M)
    Mp = _round_up(M, tm)

    a = x_nhwc.reshape(M, Cin).astype(jnp.bfloat16)   # bf16 -> half the A DMA bytes
    if Mp != M or Kp != Cin:
        a = jnp.pad(a, ((0, Mp - M), (0, Kp - Cin)))

    args = [a, w_pad, b_pad]
    in_specs = [
        pl.BlockSpec((tm, Kp), lambda i: (i, 0)),     # tk = full Cin (no K loop)
        pl.BlockSpec((Kp, _NP), lambda i: (0, 0)),    # weights resident across grid
        pl.BlockSpec((1, _NP), lambda i: (0, 0)),
    ]
    has_skip = skip_pre is not None
    if has_skip:
        s = skip_pre.reshape(M, _COUT).astype(jnp.float32)
        s = jnp.pad(s, ((0, Mp - M), (0, _NP - _COUT)))   # lane-pad once
        args.append(s)
        in_specs.append(pl.BlockSpec((tm, _NP), lambda i: (i, 0)))

    out = pl.pallas_call(
        functools.partial(_conv1x1_kernel, has_skip),
        out_shape=jax.ShapeDtypeStruct((Mp, _NP), jnp.float32),
        grid_spec=pltpu.PrefetchScalarGridSpec(
            num_scalar_prefetch=0,
            grid=(Mp // tm,),
            in_specs=in_specs,
            out_specs=pl.BlockSpec((tm, _NP), lambda i: (i, 0)),
        ),
        compiler_params=pltpu.CompilerParams(
            dimension_semantics=("parallel",)),
    )(*args)
    return out[:M, :_COUT].reshape(N, H, W, _COUT)


# --------------------------------------------------------------------------
# Wavelet / blur-upsample skip path (fixed-weight polyphase relayouts).
# Plain-JAX data-movement glue: reshape/stack interleaves only, no scatters,
# no gathers.
# TODO(synk): these 2-tap band mixes could additionally be folded into the
# Pallas epilogue; they are cheap VPU work + relayout, while the conv (the
# only MXU op of this module) already runs fused in Pallas.
# --------------------------------------------------------------------------
def _haar_inv_nhwc(x):
    """InverseHaarTransform: (N,h,w,4C) [ll|lh|hl|hh] -> (N,2h,2w,C)."""
    N, h, w, c4 = x.shape
    c = c4 // 4
    ll, lh, hl, hh = x[..., :c], x[..., c:2 * c], x[..., 2 * c:3 * c], x[..., 3 * c:]
    a = 0.5 * (ll + lh + hl + hh)     # (even row, even col)
    b = 0.5 * (ll + lh - hl - hh)     # (even row, odd  col)
    c_ = 0.5 * (ll - lh + hl - hh)    # (odd  row, even col)
    d = 0.5 * (ll - lh - hl + hh)     # (odd  row, odd  col)
    top = jnp.stack([a, b], axis=3).reshape(N, h, 2 * w, c)
    bot = jnp.stack([c_, d], axis=3).reshape(N, h, 2 * w, c)
    return jnp.stack([top, bot], axis=2).reshape(N, 2 * h, 2 * w, c)


def _haar_fwd_nhwc(x):
    """HaarTransform: (N,H,W,C) -> (N,H/2,W/2,4C) [ll|lh|hl|hh]."""
    N, H, W, C = x.shape
    xr = x.reshape(N, H // 2, 2, W // 2, 2, C)
    a, b = xr[:, :, 0, :, 0, :], xr[:, :, 0, :, 1, :]
    c_, d = xr[:, :, 1, :, 0, :], xr[:, :, 1, :, 1, :]
    ll = 0.5 * (a + b + c_ + d)
    lh = 0.5 * (a + b - c_ - d)
    hl = 0.5 * (a - b + c_ - d)
    hh = 0.5 * (a - b - c_ + d)
    return jnp.concatenate([ll, lh, hl, hh], axis=-1)


def _blur_upsample_2x_nhwc(x):
    """Upsample(blur_kernel=[1,3,3,1], factor=2) == upfirdn2d(up=2, pad=(2,1)).

    Separable polyphase form (zero boundary, 1-D taps [1,3,3,1]/4):
        out[2t]   = 0.25*x[t-1] + 0.75*x[t]
        out[2t+1] = 0.75*x[t]   + 0.25*x[t+1]
    """
    N, H, W, C = x.shape
    prev = jnp.pad(x, ((0, 0), (1, 0), (0, 0), (0, 0)))[:, :H]
    nxt = jnp.pad(x, ((0, 0), (0, 1), (0, 0), (0, 0)))[:, 1:]
    x = jnp.stack([0.25 * prev + 0.75 * x, 0.75 * x + 0.25 * nxt],
                  axis=2).reshape(N, 2 * H, W, C)
    prev = jnp.pad(x, ((0, 0), (0, 0), (1, 0), (0, 0)))[:, :, :W]
    nxt = jnp.pad(x, ((0, 0), (0, 0), (0, 1), (0, 0)))[:, :, 1:]
    return jnp.stack([0.25 * prev + 0.75 * x, 0.75 * x + 0.25 * nxt],
                     axis=3).reshape(N, 2 * H, 2 * W, C)


# --------------------------------------------------------------------------
# module: params + forward
# --------------------------------------------------------------------------
def init_torgb_params(key, in_channel):
    """nn.Conv2d(in_channel, 12, 1) weights + pre-padded/transposed Pallas copies."""
    kw, kb = jax.random.split(key)
    w = jax.random.normal(kw, (_COUT, in_channel), jnp.float32) * 0.05   # (Cout, Cin)
    b = jax.random.normal(kb, (_COUT,), jnp.float32) * 0.01
    # pre-pad + pre-transpose ONCE (static): (Kp, 128) bf16 weights, (1, 128) f32 bias
    kp = _round_up(in_channel, 16)
    w_pad = jnp.zeros((kp, _NP), jnp.float32).at[:in_channel, :_COUT].set(w.T)
    return {'w': w, 'b': b,
            'w_pad': w_pad.astype(jnp.bfloat16),
            'b_pad': jnp.zeros((1, _NP), jnp.float32).at[0, :_COUT].set(b)}


@jax.jit
def _forward_no_skip(params, x_nchw):
    x = jnp.transpose(x_nchw, (0, 2, 3, 1)).astype(jnp.float32)       # NHWC
    out = _conv1x1_fused(params, x, None)
    return jnp.transpose(out, (0, 3, 1, 2))


@jax.jit
def _forward_with_skip(params, x_nchw, skip_nchw):
    x = jnp.transpose(x_nchw, (0, 2, 3, 1)).astype(jnp.float32)       # NHWC
    skip = jnp.transpose(skip_nchw, (0, 2, 3, 1)).astype(jnp.float32)
    s = _haar_inv_nhwc(skip)          # iwt      : (N,h,w,12)  -> (N,2h,2w,3)
    s = _blur_upsample_2x_nhwc(s)     # Upsample : (N,2h,2w,3) -> (N,4h,4w,3)
    s = _haar_fwd_nhwc(s)             # dwt      : (N,4h,4w,3) -> (N,2h,2w,12)
    out = _conv1x1_fused(params, x, s)   # conv + bias + skip add, one Pallas pass
    return jnp.transpose(out, (0, 3, 1, 2))


def torgb_wavelet_forward(params, input_nchw, skip_nchw=None):
    """Forward of ToRGB_wavelet. input: NCHW float32, skip: NCHW (12 ch) or None."""
    if skip_nchw is None:
        return _forward_no_skip(params, input_nchw)
    return _forward_with_skip(params, input_nchw, skip_nchw)


# --------------------------------------------------------------------------
# Pure-JAX float32 reference (exact upfirdn2d semantics) for validation.
# --------------------------------------------------------------------------
def _upfirdn2d_ref(x, kernel, up=1, down=1, pad=(0, 0)):
    N, C, H, W = x.shape
    xr = x.reshape(N * C, 1, H, W)
    kflip = jnp.flip(kernel, (0, 1))[None, None]
    pad_hi = pad[1] + (up - 1)            # upfirdn zero-stuffs to length H*up
    out = lax.conv_general_dilated(
        xr, kflip, window_strides=(down, down),
        padding=((pad[0], pad_hi), (pad[0], pad_hi)),
        lhs_dilation=(up, up),
        dimension_numbers=('NCHW', 'OIHW', 'NCHW'),
        precision=lax.Precision.HIGHEST)
    return out.reshape(N, C, out.shape[2], out.shape[3])


def _haar_kernels_ref():
    s = 1.0 / jnp.sqrt(2.0)
    l = jnp.array([s, s], jnp.float32)
    h = jnp.array([-s, s], jnp.float32)
    return jnp.outer(l, l), jnp.outer(h, l), jnp.outer(l, h), jnp.outer(h, h)


def torgb_wavelet_ref(params, x_nchw, skip_nchw=None):
    w, b = params['w'], params['b']
    out = jnp.einsum('nchw,oc->nohw', x_nchw, w,
                     precision=lax.Precision.HIGHEST) + b[None, :, None, None]
    if skip_nchw is not None:
        ll, lh, hl, hh = _haar_kernels_ref()
        c = skip_nchw.shape[1] // 4
        s = (_upfirdn2d_ref(skip_nchw[:, :c], ll, up=2, pad=(1, 0))
             + _upfirdn2d_ref(skip_nchw[:, c:2 * c], -lh, up=2, pad=(1, 0))
             + _upfirdn2d_ref(skip_nchw[:, 2 * c:3 * c], -hl, up=2, pad=(1, 0))
             + _upfirdn2d_ref(skip_nchw[:, 3 * c:], hh, up=2, pad=(1, 0)))
        blur = jnp.outer(jnp.array([1., 3., 3., 1.], jnp.float32),
                         jnp.array([1., 3., 3., 1.], jnp.float32))
        blur = blur / jnp.sum(blur) * 4.0            # make_kernel(k) * factor**2
        s = _upfirdn2d_ref(s, blur, up=2, down=1, pad=(2, 1))
        s = jnp.concatenate([_upfirdn2d_ref(s, k, down=2)
                             for k in (ll, lh, hl, hh)], axis=1)
        out = out + s
    return out


# --------------------------------------------------------------------------
if __name__ == "__main__":
    key = jax.random.PRNGKey(0)
    kp_, kx_, ks_ = jax.random.split(key, 3)

    in_channel = 64                                  # last generator stage width
    params = init_torgb_params(kp_, in_channel)

    x = jax.random.normal(kx_, (2, in_channel, 16, 16), jnp.float32)   # features
    skip = jax.random.normal(ks_, (2, 12, 8, 8), jnp.float32)          # prev ToRGB out

    out = jax.block_until_ready(torgb_wavelet_forward(params, x, skip))
    out_ns = jax.block_until_ready(torgb_wavelet_forward(params, x, None))
    assert out.shape == (2, 12, 16, 16), out.shape
    assert out_ns.shape == (2, 12, 16, 16), out_ns.shape
    assert bool(jnp.all(jnp.isfinite(out)))
    assert bool(jnp.all(jnp.isfinite(out_ns)))

    ref = torgb_wavelet_ref(params, x, skip)
    ref_ns = torgb_wavelet_ref(params, x, None)
    assert bool(jnp.allclose(out, ref, atol=5e-2, rtol=5e-2)), \
        float(jnp.max(jnp.abs(out - ref)))
    assert bool(jnp.allclose(out_ns, ref_ns, atol=5e-2, rtol=5e-2)), \
        float(jnp.max(jnp.abs(out_ns - ref_ns)))

    print("KERNEL_OK")
</pallas_src>

<mosaic_0001>
module attributes {stable_mosaic.version = 11 : i64} {
  func.func @_conv1x1_kernel(%arg0: i32, %arg1: memref<256x64xbf16, #tpu.memory_space<vmem>>, %arg2: memref<64x128xbf16, #tpu.memory_space<vmem>>, %arg3: memref<1x128xf32, #tpu.memory_space<vmem>>, %arg4: memref<256x128xf32, #tpu.memory_space<vmem>>, %arg5: memref<256x128xf32, #tpu.memory_space<vmem>>) attributes {dimension_semantics = [#tpu.dimension_semantics<parallel>], iteration_bounds = array<i64: 2>, scalar_prefetch = 0 : i64, scratch_operands = 0 : i64, tpu.core_type = #tpu.core_type<tc>, window_params = [{transform_indices = @transform_0, window_bounds = array<i64: 256, 64>}, {pipeline_mode = #tpu.pipeline_mode<synchronous>, transform_indices = @transform_1, window_bounds = array<i64: 64, 128>}, {pipeline_mode = #tpu.pipeline_mode<synchronous>, transform_indices = @transform_2, window_bounds = array<i64: 1, 128>}, {transform_indices = @transform_3, window_bounds = array<i64: 256, 128>}, {transform_indices = @transform_4, window_bounds = array<i64: 256, 128>}]} {
    %c0 = arith.constant 0 : index
    %c0_0 = arith.constant 0 : index
    %0 = vector.load %arg1[%c0, %c0_0] : memref<256x64xbf16, #tpu.memory_space<vmem>>, vector<256x64xbf16>
    %c0_1 = arith.constant 0 : index
    %c0_2 = arith.constant 0 : index
    %1 = vector.load %arg2[%c0_1, %c0_2] : memref<64x128xbf16, #tpu.memory_space<vmem>>, vector<64x128xbf16>
    %cst = arith.constant dense<0.000000e+00> : vector<256x128xf32>
    %2 = tpu.matmul %0, %1, %cst {dimension_numbers = #tpu.dot_dimension_numbers<[1], [0], [0], [1], [0, 0, 1, 1], [], []>} : vector<256x64xbf16>, vector<64x128xbf16>, vector<256x128xf32> -> vector<256x128xf32>
    %c0_3 = arith.constant 0 : index
    %c0_4 = arith.constant 0 : index
    %3 = vector.load %arg3[%c0_3, %c0_4] : memref<1x128xf32, #tpu.memory_space<vmem>>, vector<1x128xf32>
    %4 = vector.broadcast %3 : vector<1x128xf32> to vector<256x128xf32>
    %5 = arith.addf %2, %4 : vector<256x128xf32>
    %c0_5 = arith.constant 0 : index
    %c0_6 = arith.constant 0 : index
    %6 = vector.load %arg4[%c0_5, %c0_6] : memref<256x128xf32, #tpu.memory_space<vmem>>, vector<256x128xf32>
    %7 = arith.addf %5, %6 : vector<256x128xf32>
    %c0_7 = arith.constant 0 : index
    %c0_8 = arith.constant 0 : index
    %8 = vector.load %arg5[%c0_7, %c0_8] : memref<256x128xf32, #tpu.memory_space<vmem>>, vector<256x128xf32>
    tpu.vector_store %arg5[%c0_7, %c0_8], %7 {strides = array<i32>} : memref<256x128xf32, #tpu.memory_space<vmem>>, vector<256x128xf32>,
    return
  }
  func.func @transform_0(%arg0: i32) -> (i32, i32) {
    %c0_i32 = arith.constant 0 : i32
    %c0_i32_0 = arith.constant 0 : i32
    return %arg0, %c0_i32 : i32, i32
  }
  func.func @transform_1(%arg0: i32) -> (i32, i32) {
    %c0_i32 = arith.constant 0 : i32
    %c0_i32_0 = arith.constant 0 : i32
    %c0_i32_1 = arith.constant 0 : i32
    return %c0_i32, %c0_i32_0 : i32, i32
  }
  func.func @transform_2(%arg0: i32) -> (i32, i32) {
    %c0_i32 = arith.constant 0 : i32
    %c0_i32_0 = arith.constant 0 : i32
    %c0_i32_1 = arith.constant 0 : i32
    return %c0_i32, %c0_i32_0 : i32, i32
  }
  func.func @transform_3(%arg0: i32) -> (i32, i32) {
    %c0_i32 = arith.constant 0 : i32
    %c0_i32_0 = arith.constant 0 : i32
    return %arg0, %c0_i32 : i32, i32
  }
  func.func @transform_4(%arg0: i32) -> (i32, i32) {
    %c0_i32 = arith.constant 0 : i32
    %c0_i32_0 = arith.constant 0 : i32
    return %arg0, %c0_i32 : i32, i32
  }
}

</mosaic_0001>

<bundles_post_ra>
// kernel: _forward_with_skip.1
= control target key start
LH: loop header
LB: loop body
LE: loop exit
PB: predicated region body
PF: predicated region fallthrough
CT: control target
= control target key end

     0   :  { %s928_s15 = smov 0   ;;  %s1103_s0 = inlined_call_operand.vmem [shape: bf16[512,64], index: 0, kind: input, shape index: {}]   ;;  %s1104_s1 = inlined_call_operand.vmem [shape: bf16[64,128], index: 1, kind: input, shape index: {}]   ;;  %s1105_s2 = inlined_call_operand.vmem [shape: f32[1,128], index: 2, kind: input, shape index: {}]   ;;  %s1106_s3 = inlined_call_operand.vmem [shape: f32[512,128], index: 3, kind: input, shape index: {}]   ;;  %s1107_s4 = inlined_call_operand.vmem [shape: f32[512,128], index: 4, kind: output, shape index: {}]  }
   0x1 LB: > { %s749_s16 = sadd.s32 4294967295, %s901_s15   ;;  %p753_p0 = scmp.ge.s32.totalorder %s901_s15, 1  ;;  %s901_s15 = sphi %s928_s15, %s14_s15  }
   0x2   : > { %p174_p1 = scmp.lt.s32.totalorder %s901_s15, 3 }
   0x4   : > { %p175_p2 = pnand %p753_p0, %p174_p1 }
   0x5   : > { %v875_v0 = vld [vmem:[%s1104_s1] sm:$0xff] (!%p175_p2)   ;;  %s754_s19 = sshll.u32 (!%p175_p2), %s749_s16, 5  ;;  %v876_v1 = vld [vmem:[%s1104_s1 + $0x8] sm:$0xff] (!%p175_p2)   ;;  %v877_v2 = vld [vmem:[%s1104_s1 + $0x10] sm:$0xff] (!%p175_p2)   ;;  %vm375_vm0 = vcmask (!%p175_p2), 523264  }
   0x6   : > { %178 = sbr.rel (%p175_p2) target bundleno = 266 (0x10a), region = 36  ;;  %p206_p3 = scmp.lt.s32.totalorder (!%p175_p2), %s754_s19, 63  ;;  %819 = vmatprep.subr.bf16.mxu0 (!%p175_p2), %v875_v0  ;;  %859 = vmatprep.subr.bf16.mxu1 (!%p175_p2), %v875_v0  ;;  %v878_v3 = vld [vmem:[%s1104_s1 + $0x18] sm:$0xff] (!%p175_p2)   ;;  %v997_v20 = vld [vmem:[%s1105_s2] ss:$0 sm:$0xff] (!%p175_p2) }
   0x7   : > { %820 = vmatpush3.bf16.msra.mxu0 (!%p175_p2), %v875_v0  ;;  %863 = vmatpush3.bf16.msra.mxu1 (!%p175_p2), %v875_v0 }
   0x8   : > { %821 = vmatprep.subr.bf16.mxu0 (!%p175_p2), %v876_v1  ;;  %860 = vmatprep.subr.bf16.mxu1 (!%p175_p2), %v876_v1 }
   0xb   : > { %822 = vmatpush3.bf16.msra.mxu0 (!%p175_p2), %v876_v1  ;;  %864 = vmatpush3.bf16.msra.mxu1 (!%p175_p2), %v876_v1 }
   0xc   : > { %823 = vmatprep.subr.bf16.mxu0 (!%p175_p2), %v877_v2  ;;  %861 = vmatprep.subr.bf16.mxu1 (!%p175_p2), %v877_v2 }
   0xd   : > { %s1109_s19 = smov (!%p206_p3, %s754_s19), 63 }
   0xe   : > { %s755_s24 = sshll.u32 %s1109_s19, 2  ;;  %s757_s30 = sshll.u32 %s1109_s19, 3 }
   0xf   : > { %s954_s29 = scalar_lea.vmem %s1103_s0, %s755_s24  ;;  %824 = vmatpush3.bf16.msra.mxu0 %v877_v2  ;;  %865 = vmatpush3.bf16.msra.mxu1 %v877_v2  ;;  %s992_s7 = scalar_lea.vmem %s1106_s3, %s757_s30 }
  0x10   : > { %v879_v4 = vld [vmem:[%s954_s29] sm:$0xff]   ;;  %825 = vmatprep.subr.bf16.mxu0 %v878_v3  ;;  %862 = vmatprep.subr.bf16.mxu1 %v878_v3  ;;  %v881_v6 = vld [vmem:[%s954_s29 + $0x8] sm:$0xff]   ;;  %v883_v8 = vld [vmem:[%s954_s29 + $0x10] sm:$0xff]   ;;  %s1008_s12 = scalar_lea.vmem %s1107_s4, %s757_s30 }
  0x11   : > { %v880_v5 = vld [vmem:[%s954_s29 + $0x40] sm:$0xff]   ;;  %827 = vmatprep.mubr.msk.bf16.mxu0 %vm375_vm0, %v879_v4  ;;  %v882_v7 = vld [vmem:[%s954_s29 + $0x48] sm:$0xff]   ;;  %v884_v9 = vld [vmem:[%s954_s29 + $0x50] sm:$0xff]  }
  0x12   : > { %843 = vmatprep.mubr.msk.bf16.mxu1 %vm375_vm0, %v880_v5  ;;  %v885_v10 = vld [vmem:[%s954_s29 + $0x18] sm:$0xff]   ;;  %v887_v12 = vld [vmem:[%s954_s29 + $0x20] sm:$0xff]   ;;  %v889_v14 = vld [vmem:[%s954_s29 + $0x28] sm:$0xff]  }
  0x13   : > { %826 = vmatpush3.bf16.msra.mxu0 %v878_v3  ;;  %866 = vmatpush3.bf16.msra.mxu1 %v878_v3  ;;  %v886_v11 = vld [vmem:[%s954_s29 + $0x58] sm:$0xff]   ;;  %v888_v13 = vld [vmem:[%s954_s29 + $0x60] sm:$0xff]   ;;  %v890_v15 = vld [vmem:[%s954_s29 + $0x68] sm:$0xff]  }
  0x14   : > { %v891_v16 = vld [vmem:[%s954_s29 + $0x30] sm:$0xff]   ;;  %v893_v18 = vld [vmem:[%s954_s29 + $0x38] sm:$0xff]   ;;  %v585_v28 = vld [vmem:[%s992_s7] sm:$0xff] }
  0x15   : > { %v892_v17 = vld [vmem:[%s954_s29 + $0x70] sm:$0xff]   ;;  %v894_v19 = vld [vmem:[%s954_s29 + $0x78] sm:$0xff]   ;;  %v601_v30 = vld [vmem:[%s992_s7 + $0x80] sm:$0xff] }
  0x16   : > { %828 = vmatmul.mubr.msk.bf16.vlgmr.msra.gmra.mrb[0].mxu0 %vm375_vm0, %v881_v6  ;;  %844 = vmatmul.mubr.msk.bf16.vlgmr.msra.gmra.mrb[0].mxu1 %vm375_vm0, %v882_v7  ;;  %v587_v22 = vld [vmem:[%s992_s7 + $0x10] sm:$0xff]  ;;  %v588_v34 = vld [vmem:[%s992_s7 + $0x18] sm:$0xff]  ;;  %v586_v42 = vld [vmem:[%s992_s7 + $0x8] sm:$0xff] }
  0x17   : > { %831 = vmatprep.mubr.msk.bf16.mxu0 %vm375_vm0, %v883_v8  ;;  %847 = vmatprep.mubr.msk.bf16.mxu1 %vm375_vm0, %v884_v9  ;;  %v603_v24 = vld [vmem:[%s992_s7 + $0x90] sm:$0xff]  ;;  %v604_v36 = vld [vmem:[%s992_s7 + $0x98] sm:$0xff]  ;;  %v602_v44 = vld [vmem:[%s992_s7 + $0x88] sm:$0xff] }
  0x18   : > { %v591_v54 = vld [vmem:[%s992_s7 + $0x30] sm:$0xff]  ;;  %v589_v60 = vld [vmem:[%s992_s7 + $0x20] sm:$0xff]  ;;  %v592_v2 = vld [vmem:[%s992_s7 + $0x38] sm:$0xff] }
  0x19   : > { %v607_v56 = vld [vmem:[%s992_s7 + $0xb0] sm:$0xff]  ;;  %v605_v62 = vld [vmem:[%s992_s7 + $0xa0] sm:$0xff]  ;;  %v608_v4 = vld [vmem:[%s992_s7 + $0xb8] sm:$0xff] }
  0x1e   : > { %832 = vmatmul.mubr.msk.bf16.gmra.mrb[4].mxu0 %vm375_vm0, %v885_v10  ;;  %848 = vmatmul.mubr.msk.bf16.gmra.mrb[4].mxu1 %vm375_vm0, %v886_v11  ;;  %v590_v10 = vld [vmem:[%s992_s7 + $0x28] sm:$0xff] }
  0x1f   : > { %835 = vmatprep.mubr.msk.bf16.mxu0 %vm375_vm0, %v887_v12  ;;  %851 = vmatprep.mubr.msk.bf16.mxu1 %vm375_vm0, %v888_v13  ;;  %v606_v12 = vld [vmem:[%s992_s7 + $0xa8] sm:$0xff] }
  0x26   : > { %836 = vmatmul.mubr.msk.bf16.gmra.mrb[8].mxu0 %vm375_vm0, %v889_v14  ;;  %852 = vmatmul.mubr.msk.bf16.gmra.mrb[8].mxu1 %vm375_vm0, %v890_v15 }
  0x27   : > { %839 = vmatprep.mubr.msk.bf16.mxu0 %vm375_vm0, %v891_v16  ;;  %855 = vmatprep.mubr.msk.bf16.mxu1 %vm375_vm0, %v892_v17 }
  0x2e   : > { %840 = vmatmul.mubr.msk.bf16.gmra.mrb[12].mxu0 %vm375_vm0, %v893_v18  ;;  %856 = vmatmul.mubr.msk.bf16.gmra.mrb[12].mxu1 %vm375_vm0, %v894_v19 }
  0xe9   : > { %v829_v21 = vpop.f32.mrb[0].mxu0  ;;  %v845_v23 = vpop.f32.mrb[0].mxu1 }
  0xea   : > { %v467_v25 = vadd.f32 %v829_v21, %v997_v20  ;;  %v531_v26 = vadd.f32 %v845_v23, %v997_v20  ;;  %v458_v27 = vpop.f32.mrb[1].mxu0  ;;  %v522_v29 = vpop.f32.mrb[1].mxu1  ;;  %v595_v23 = vld [vmem:[%s992_s7 + $0x50] sm:$0xff] }
  0xeb   : > { %v459_v31 = vadd.f32 %v997_v20, %v458_v27  ;;  %v523_v32 = vadd.f32 %v997_v20, %v522_v29  ;;  %v830_v33 = vpop.f32.mrb[2].mxu0  ;;  %v846_v35 = vpop.f32.mrb[2].mxu1  ;;  %v593_v29 = vld [vmem:[%s992_s7 + $0x40] sm:$0xff] }
  0xec   : > { %v619_v37 = vadd.f32 %v587_v22, %v467_v25  ;;  %v635_v38 = vadd.f32 %v603_v24, %v531_v26  ;;  %v470_v39 = vadd.f32 %v830_v33, %v997_v20  ;;  %v534_v40 = vadd.f32 %v846_v35, %v997_v20  ;;  %v461_v41 = vpop.f32.mrb[3].mxu0  ;;  %v525_v43 = vpop.f32.mrb[3].mxu1  ;;  %v611_v25 = vld [vmem:[%s992_s7 + $0xd0] sm:$0xff]  ;;  %v596_v35 = vld [vmem:[%s992_s7 + $0x58] sm:$0xff] }
  0xed   : > { %v617_v45 = vadd.f32 %v585_v28, %v459_v31  ;;  %v633_v46 = vadd.f32 %v601_v30, %v523_v32  ;;  %v462_v47 = vadd.f32 %v997_v20, %v461_v41  ;;  %v526_v48 = vadd.f32 %v997_v20, %v525_v43  ;;  %v609_v31 = vld [vmem:[%s992_s7 + $0xc0] sm:$0xff]  ;;  %v594_v43 = vld [vmem:[%s992_s7 + $0x48] sm:$0xff] }
  0xee   : > { %651 = vst [vmem:[%s1008_s12 + $0x10] sm:$0xff] %v619_v37  ;;  %667 = vst [vmem:[%s1008_s12 + $0x90] sm:$0xff] %v635_v38  ;;  %v620_v49 = vadd.f32 %v588_v34, %v470_v39  ;;  %v636_v50 = vadd.f32 %v604_v36, %v534_v40  ;;  %v612_v37 = vld [vmem:[%s992_s7 + $0xd8] sm:$0xff] }
  0xef   : > { %649 = vst [vmem:[%s1008_s12] sm:$0xff] %v617_v45  ;;  %665 = vst [vmem:[%s1008_s12 + $0x80] sm:$0xff] %v633_v46  ;;  %v618_v51 = vadd.f32 %v586_v42, %v462_v47  ;;  %v634_v52 = vadd.f32 %v602_v44, %v526_v48  ;;  %v610_v45 = vld [vmem:[%s992_s7 + $0xc8] sm:$0xff] }
  0xf0   : > { %652 = vst [vmem:[%s1008_s12 + $0x18] sm:$0xff] %v620_v49  ;;  %668 = vst [vmem:[%s1008_s12 + $0x98] sm:$0xff] %v636_v50 }
  0xf1   : > { %650 = vst [vmem:[%s1008_s12 + $0x8] sm:$0xff] %v618_v51  ;;  %666 = vst [vmem:[%s1008_s12 + $0x88] sm:$0xff] %v634_v52  ;;  %v833_v53 = vpop.f32.mrb[4].mxu0  ;;  %v849_v55 = vpop.f32.mrb[4].mxu1 }
  0xf2   : > { %v483_v57 = vadd.f32 %v833_v53, %v997_v20  ;;  %v547_v58 = vadd.f32 %v849_v55, %v997_v20  ;;  %v474_v59 = vpop.f32.mrb[5].mxu0  ;;  %v538_v61 = vpop.f32.mrb[5].mxu1  ;;  %v599_v55 = vld [vmem:[%s992_s7 + $0x70] sm:$0xff] }
  0xf3   : > { %v475_v63 = vadd.f32 %v997_v20, %v474_v59  ;;  %v539_v0 = vadd.f32 %v997_v20, %v538_v61  ;;  %v834_v1 = vpop.f32.mrb[6].mxu0  ;;  %v850_v3 = vpop.f32.mrb[6].mxu1  ;;  %v597_v61 = vld [vmem:[%s992_s7 + $0x60] sm:$0xff] }
  0xf4   : > { %v623_v5 = vadd.f32 %v591_v54, %v483_v57  ;;  %v639_v6 = vadd.f32 %v607_v56, %v547_v58  ;;  %v486_v7 = vadd.f32 %v834_v1, %v997_v20  ;;  %v550_v8 = vadd.f32 %v850_v3, %v997_v20  ;;  %v477_v9 = vpop.f32.mrb[7].mxu0  ;;  %v541_v11 = vpop.f32.mrb[7].mxu1  ;;  %v615_v57 = vld [vmem:[%s992_s7 + $0xf0] sm:$0xff]  ;;  %v600_v3 = vld [vmem:[%s992_s7 + $0x78] sm:$0xff] }
  0xf5   : > { %v621_v13 = vadd.f32 %v589_v60, %v475_v63  ;;  %v637_v14 = vadd.f32 %v605_v62, %v539_v0  ;;  %v478_v15 = vadd.f32 %v997_v20, %v477_v9  ;;  %v542_v16 = vadd.f32 %v997_v20, %v541_v11  ;;  %v613_v63 = vld [vmem:[%s992_s7 + $0xe0] sm:$0xff]  ;;  %v598_v11 = vld [vmem:[%s992_s7 + $0x68] sm:$0xff] }
  0xf6   : > { %655 = vst [vmem:[%s1008_s12 + $0x30] sm:$0xff] %v623_v5  ;;  %671 = vst [vmem:[%s1008_s12 + $0xb0] sm:$0xff] %v639_v6  ;;  %v624_v17 = vadd.f32 %v592_v2, %v486_v7  ;;  %v640_v18 = vadd.f32 %v608_v4, %v550_v8  ;;  %v616_v5 = vld [vmem:[%s992_s7 + $0xf8] sm:$0xff] }
  0xf7   : > { %653 = vst [vmem:[%s1008_s12 + $0x20] sm:$0xff] %v621_v13  ;;  %669 = vst [vmem:[%s1008_s12 + $0xa0] sm:$0xff] %v637_v14  ;;  %v622_v19 = vadd.f32 %v590_v10, %v478_v15  ;;  %v638_v21 = vadd.f32 %v606_v12, %v542_v16  ;;  %v614_v13 = vld [vmem:[%s992_s7 + $0xe8] sm:$0xff] }
  0xf8   : > { %656 = vst [vmem:[%s1008_s12 + $0x38] sm:$0xff] %v624_v17  ;;  %672 = vst [vmem:[%s1008_s12 + $0xb8] sm:$0xff] %v640_v18 }
  0xf9   : > { %654 = vst [vmem:[%s1008_s12 + $0x28] sm:$0xff] %v622_v19  ;;  %670 = vst [vmem:[%s1008_s12 + $0xa8] sm:$0xff] %v638_v21  ;;  %v837_v22 = vpop.f32.mrb[8].mxu0  ;;  %v853_v24 = vpop.f32.mrb[8].mxu1 }
  0xfa   : > { %v499_v26 = vadd.f32 %v837_v22, %v997_v20  ;;  %v563_v27 = vadd.f32 %v853_v24, %v997_v20  ;;  %v490_v28 = vpop.f32.mrb[9].mxu0  ;;  %v554_v30 = vpop.f32.mrb[9].mxu1 }
  0xfb   : > { %v491_v32 = vadd.f32 %v997_v20, %v490_v28  ;;  %v555_v33 = vadd.f32 %v997_v20, %v554_v30  ;;  %v838_v34 = vpop.f32.mrb[10].mxu0  ;;  %v854_v36 = vpop.f32.mrb[10].mxu1 }
  0xfc   : > { %v627_v38 = vadd.f32 %v595_v23, %v499_v26  ;;  %v643_v39 = vadd.f32 %v611_v25, %v563_v27  ;;  %v502_v40 = vadd.f32 %v838_v34, %v997_v20  ;;  %v566_v41 = vadd.f32 %v854_v36, %v997_v20  ;;  %v493_v42 = vpop.f32.mrb[11].mxu0  ;;  %v557_v44 = vpop.f32.mrb[11].mxu1 }
  0xfd   : > { %v625_v46 = vadd.f32 %v593_v29, %v491_v32  ;;  %v641_v47 = vadd.f32 %v609_v31, %v555_v33  ;;  %v494_v48 = vadd.f32 %v997_v20, %v493_v42  ;;  %v558_v49 = vadd.f32 %v997_v20, %v557_v44 }
  0xfe   : > { %659 = vst [vmem:[%s1008_s12 + $0x50] sm:$0xff] %v627_v38  ;;  %675 = vst [vmem:[%s1008_s12 + $0xd0] sm:$0xff] %v643_v39  ;;  %v628_v50 = vadd.f32 %v596_v35, %v502_v40  ;;  %v644_v51 = vadd.f32 %v612_v37, %v566_v41 }
  0xff   : > { %657 = vst [vmem:[%s1008_s12 + $0x40] sm:$0xff] %v625_v46  ;;  %673 = vst [vmem:[%s1008_s12 + $0xc0] sm:$0xff] %v641_v47  ;;  %v626_v52 = vadd.f32 %v594_v43, %v494_v48  ;;  %v642_v53 = vadd.f32 %v610_v45, %v558_v49 }
 0x100   : > { %660 = vst [vmem:[%s1008_s12 + $0x58] sm:$0xff] %v628_v50  ;;  %676 = vst [vmem:[%s1008_s12 + $0xd8] sm:$0xff] %v644_v51 }
 0x101   : > { %658 = vst [vmem:[%s1008_s12 + $0x48] sm:$0xff] %v626_v52  ;;  %674 = vst [vmem:[%s1008_s12 + $0xc8] sm:$0xff] %v642_v53  ;;  %v841_v54 = vpop.f32.mrb[12].mxu0  ;;  %v857_v56 = vpop.f32.mrb[12].mxu1 }
 0x102   : > { %v515_v58 = vadd.f32 %v841_v54, %v997_v20  ;;  %v579_v59 = vadd.f32 %v857_v56, %v997_v20  ;;  %v506_v60 = vpop.f32.mrb[13].mxu0  ;;  %v570_v62 = vpop.f32.mrb[13].mxu1 }
 0x103   : > { %v507_v0 = vadd.f32 %v997_v20, %v506_v60  ;;  %v571_v1 = vadd.f32 %v997_v20, %v570_v62  ;;  %v842_v2 = vpop.f32.mrb[14].mxu0  ;;  %v858_v4 = vpop.f32.mrb[14].mxu1 }
 0x104   : > { %v631_v6 = vadd.f32 %v599_v55, %v515_v58  ;;  %v647_v7 = vadd.f32 %v615_v57, %v579_v59  ;;  %v518_v8 = vadd.f32 %v842_v2, %v997_v20  ;;  %v582_v9 = vadd.f32 %v858_v4, %v997_v20  ;;  %v509_v10 = vpop.f32.mrb[15].mxu0  ;;  %v573_v12 = vpop.f32.mrb[15].mxu1 }
 0x105   : > { %v629_v14 = vadd.f32 %v597_v61, %v507_v0  ;;  %v645_v15 = vadd.f32 %v613_v63, %v571_v1  ;;  %v510_v16 = vadd.f32 %v997_v20, %v509_v10  ;;  %v574_v17 = vadd.f32 %v997_v20, %v573_v12 }
 0x106   : > { %663 = vst [vmem:[%s1008_s12 + $0x70] sm:$0xff] %v631_v6  ;;  %679 = vst [vmem:[%s1008_s12 + $0xf0] sm:$0xff] %v647_v7  ;;  %v632_v18 = vadd.f32 %v600_v3, %v518_v8  ;;  %v648_v19 = vadd.f32 %v616_v5, %v582_v9 }
 0x107   : > { %661 = vst [vmem:[%s1008_s12 + $0x60] sm:$0xff] %v629_v14  ;;  %677 = vst [vmem:[%s1008_s12 + $0xe0] sm:$0xff] %v645_v15  ;;  %v630_v21 = vadd.f32 %v598_v11, %v510_v16  ;;  %v646_v22 = vadd.f32 %v614_v13, %v574_v17 }
 0x108   : > { %664 = vst [vmem:[%s1008_s12 + $0x78] sm:$0xff] %v632_v18  ;;  %680 = vst [vmem:[%s1008_s12 + $0xf8] sm:$0xff] %v648_v19 }
 0x109   : > { %662 = vst [vmem:[%s1008_s12 + $0x68] sm:$0xff] %v630_v21  ;;  %678 = vst [vmem:[%s1008_s12 + $0xe8] sm:$0xff] %v646_v22 }
 0x10a PF: > { %s14_s15 = sadd.s32 1, %s901_s15  }
 0x10b   : > { %p11_p4 = scmp.ge.s32.totalorder %s14_s15, 4  }
 0x10d   :  { %13 = sbr.rel (!%p11_p4) target bundleno = 1 (0x1), region = 69 }

</bundles_post_ra>
